<compile_context>
chip_gen: v6e
topology: v6e:2x2x1
jax: 0.10.0
libtpu: 0.0.40
codegen_flags: <defaults>
</compile_context>

<pallas_src>
import numpy as np
import jax
import jax.numpy as jnp
from jax import lax
from jax.experimental import pallas as pl
from jax.experimental.pallas import tpu as pltpu


def _round_up(x, m):
    return (x + m - 1) // m * m


def _make_kernel(bounds, dk):
    """bounds: static list of (start, length) segment slices; dk: true key dim."""

    def kernel(x_ref, wk_ref, bk_ref, wq_ref, bq_ref, wv_ref, out_ref):
        x = x_ref[...]                                           # (N, C) bf16

        # --- projections: bf16 MXU operands, f32 accumulation ---------------
        k_pre = jnp.dot(x, wk_ref[...],
                        preferred_element_type=jnp.float32) + bk_ref[...]
        q_pre = jnp.dot(x, wq_ref[...],
                        preferred_element_type=jnp.float32) + bq_ref[...]
        v = jnp.dot(x, wv_ref[...], preferred_element_type=jnp.float32)

        # elu(x) + 1 == x + 1 (x > 0) else exp(x)   (alpha = 1), in f32.
        k = jnp.where(k_pre > 0, k_pre + 1.0, jnp.exp(k_pre))
        q = jnp.where(q_pre > 0, q_pre + 1.0, jnp.exp(q_pre))

        # Zero the zero-padded key columns (they would be elu(0)+1 == 1).
        # Masking K alone is enough: ktv rows for padded d become 0, so the
        # padded query columns multiply zeros; padded V columns are already 0.
        col = lax.broadcasted_iota(jnp.int32, k.shape, 1)
        k = jnp.where(col < dk, k, 0.0)

        k = k.astype(jnp.bfloat16)
        q = q.astype(jnp.bfloat16)
        v = v.astype(jnp.bfloat16)

        # --- per-segment linear attention (static unroll over `lengths`) ----
        for start, length in bounds:
            k_seg = k[start:start + length]                      # (L, Dk_pad)
            v_seg = v[start:start + length]                      # (L, Do_pad)
            q_seg = q[start:start + length]                      # (L, Dk_pad)
            # K^T V: contract the row (L) dim of both operands directly on the
            # MXU -- no explicit transpose materialized.
            ktv = lax.dot_general(
                k_seg, v_seg,
                dimension_numbers=(((0,), (0,)), ((), ())),
                preferred_element_type=jnp.float32)              # (Dk_pad, Do_pad)
            contrib = jnp.dot(q_seg, ktv.astype(jnp.bfloat16),
                              preferred_element_type=jnp.float32)  # (L, Do_pad)
            out_ref[start:start + length, :] = contrib

    return kernel


def linformer_forward(features, wk, bk, wq, bq, wv, lengths):
    """features: (B, N, C) float32.  wk/wq/wv in PyTorch (out, in) layout."""
    B, N, C = features.shape
    Dk, Dq, Do = wk.shape[0], wq.shape[0], wv.shape[0]
    assert Dk == Dq, "query_dim must equal key_dim for q @ (k^T v)"
    assert sum(lengths) == N

    # Lane-dense padding of the projection dims (multiples of 128 lanes).
    Dk_pad = _round_up(Dk, 128)
    Do_pad = _round_up(Do, 128)

    bounds, start = [], 0
    for L in lengths:
        bounds.append((start, int(L)))
        start += int(L)

    # Pre-transpose weights to (in, out), zero-pad, cast MXU operands to bf16.
    wk_p = jnp.pad(wk.T, ((0, 0), (0, Dk_pad - Dk))).astype(jnp.bfloat16)
    wq_p = jnp.pad(wq.T, ((0, 0), (0, Dk_pad - Dq))).astype(jnp.bfloat16)
    wv_p = jnp.pad(wv.T, ((0, 0), (0, Do_pad - Do))).astype(jnp.bfloat16)
    bk_p = jnp.pad(bk, (0, Dk_pad - Dk)).reshape(1, Dk_pad).astype(jnp.float32)
    bq_p = jnp.pad(bq, (0, Dk_pad - Dq)).reshape(1, Dk_pad).astype(jnp.float32)
    x_bf16 = features.astype(jnp.bfloat16)

    kernel = _make_kernel(bounds, Dk)

    out_padded = pl.pallas_call(
        kernel,
        out_shape=jax.ShapeDtypeStruct((B, N, Do_pad), jnp.float32),
        grid=(B,),
        in_specs=[
            pl.BlockSpec((pl.Squeezed(), N, C), lambda b: (b, 0, 0)),   # x
            pl.BlockSpec((C, Dk_pad), lambda b: (0, 0)),                # Wk^T
            pl.BlockSpec((1, Dk_pad), lambda b: (0, 0)),                # bk
            pl.BlockSpec((C, Dk_pad), lambda b: (0, 0)),                # Wq^T
            pl.BlockSpec((1, Dk_pad), lambda b: (0, 0)),                # bq
            pl.BlockSpec((C, Do_pad), lambda b: (0, 0)),                # Wv^T
        ],
        out_specs=pl.BlockSpec((pl.Squeezed(), N, Do_pad), lambda b: (b, 0, 0)),
        compiler_params=pltpu.CompilerParams(
            dimension_semantics=("parallel",),      # shards B across TCs on v7x
            vmem_limit_bytes=32 * 1024 * 1024,      # explicit, portable budget
        ),
    )(x_bf16, wk_p, bk_p, wq_p, bq_p, wv_p)

    # Drop the zero-padded output channels.
    return out_padded[..., :Do]


def linformer_reference(features, wk, bk, wq, bq, wv, lengths):
    """Pure-JAX f32 reference matching the PyTorch forward."""
    k = jax.nn.elu(features @ wk.T + bk) + 1.0
    q = jax.nn.elu(features @ wq.T + bq) + 1.0
    v = features @ wv.T
    outs, start = [], 0
    for L in lengths:
        ks, qs, vs = (k[:, start:start + L], q[:, start:start + L],
                      v[:, start:start + L])
        ktv = jnp.einsum("bnd,bne->bde", ks, vs)
        outs.append(jnp.einsum("bnd,bde->bne", qs, ktv))
        start += L
    return jnp.concatenate(outs, axis=1)


if __name__ == "__main__":
    B, N, C = 2, 16, 32          # batch, sequence length (graph nodes), in_channels
    key_dim = query_dim = 32
    out_channels = 32
    lengths = [6, 10]            # per-graph lengths, sum == N

    key = jax.random.PRNGKey(0)
    kx, kwk, kbk, kwq, kbq, kwv = jax.random.split(key, 6)

    features = jax.random.normal(kx, (B, N, C), dtype=jnp.float32)
    # PyTorch nn.Linear weight layout: (out_features, in_features)
    wk = jax.random.normal(kwk, (key_dim, C), dtype=jnp.float32) * 0.1
    bk = jax.random.normal(kbk, (key_dim,), dtype=jnp.float32) * 0.1
    wq = jax.random.normal(kwq, (query_dim, C), dtype=jnp.float32) * 0.1
    bq = jax.random.normal(kbq, (query_dim,), dtype=jnp.float32) * 0.1
    wv = jax.random.normal(kwv, (out_channels, C), dtype=jnp.float32) * 0.1

    out = linformer_forward(features, wk, bk, wq, bq, wv, lengths)
    out = jax.block_until_ready(out)

    ref = linformer_reference(features, wk, bk, wq, bq, wv, lengths)
    # bf16 MXU operands with f32 accumulation: compare at bf16-level tolerance.
    max_abs = float(jnp.max(jnp.abs(ref)))
    np.testing.assert_allclose(np.asarray(out), np.asarray(ref),
                               rtol=2e-2, atol=2e-2 * max_abs)
    print("KERNEL_OK")
</pallas_src>

<mosaic_0001>
module attributes {stable_mosaic.version = 11 : i64} {
  func.func @kernel(%arg0: i32, %arg1: memref<1x16x32xbf16, #tpu.memory_space<vmem>>, %arg2: memref<32x128xbf16, #tpu.memory_space<vmem>>, %arg3: memref<1x128xf32, #tpu.memory_space<vmem>>, %arg4: memref<32x128xbf16, #tpu.memory_space<vmem>>, %arg5: memref<1x128xf32, #tpu.memory_space<vmem>>, %arg6: memref<32x128xbf16, #tpu.memory_space<vmem>>, %arg7: memref<1x16x128xf32, #tpu.memory_space<vmem>>) attributes {dimension_semantics = [#tpu.dimension_semantics<parallel>], iteration_bounds = array<i64: 2>, scalar_prefetch = 0 : i64, scratch_operands = 0 : i64, tpu.core_type = #tpu.core_type<tc>, window_params = [{transform_indices = @transform_0, window_bounds = array<i64: 1, 16, 32>}, {pipeline_mode = #tpu.pipeline_mode<synchronous>, transform_indices = @transform_1, window_bounds = array<i64: 32, 128>}, {pipeline_mode = #tpu.pipeline_mode<synchronous>, transform_indices = @transform_2, window_bounds = array<i64: 1, 128>}, {pipeline_mode = #tpu.pipeline_mode<synchronous>, transform_indices = @transform_3, window_bounds = array<i64: 32, 128>}, {pipeline_mode = #tpu.pipeline_mode<synchronous>, transform_indices = @transform_4, window_bounds = array<i64: 1, 128>}, {pipeline_mode = #tpu.pipeline_mode<synchronous>, transform_indices = @transform_5, window_bounds = array<i64: 32, 128>}, {transform_indices = @transform_6, window_bounds = array<i64: 1, 16, 128>}]} {
    %c0 = arith.constant 0 : index
    %c0_0 = arith.constant 0 : index
    %c0_1 = arith.constant 0 : index
    %0 = vector.load %arg1[%c0, %c0_0, %c0_1] : memref<1x16x32xbf16, #tpu.memory_space<vmem>>, vector<1x16x32xbf16>
    %1 = vector.shape_cast %0 : vector<1x16x32xbf16> to vector<16x32xbf16>
    %c0_2 = arith.constant 0 : index
    %c0_3 = arith.constant 0 : index
    %2 = vector.load %arg2[%c0_2, %c0_3] : memref<32x128xbf16, #tpu.memory_space<vmem>>, vector<32x128xbf16>
    %cst = arith.constant dense<0.000000e+00> : vector<16x128xf32>
    %3 = tpu.matmul %1, %2, %cst {dimension_numbers = #tpu.dot_dimension_numbers<[1], [0], [0], [1], [0, 0, 1, 1], [], []>} : vector<16x32xbf16>, vector<32x128xbf16>, vector<16x128xf32> -> vector<16x128xf32>
    %c0_4 = arith.constant 0 : index
    %c0_5 = arith.constant 0 : index
    %4 = vector.load %arg3[%c0_4, %c0_5] : memref<1x128xf32, #tpu.memory_space<vmem>>, vector<1x128xf32>
    %5 = vector.broadcast %4 : vector<1x128xf32> to vector<16x128xf32>
    %6 = arith.addf %3, %5 : vector<16x128xf32>
    %c0_6 = arith.constant 0 : index
    %c0_7 = arith.constant 0 : index
    %7 = vector.load %arg4[%c0_6, %c0_7] : memref<32x128xbf16, #tpu.memory_space<vmem>>, vector<32x128xbf16>
    %cst_8 = arith.constant dense<0.000000e+00> : vector<16x128xf32>
    %8 = tpu.matmul %1, %7, %cst_8 {dimension_numbers = #tpu.dot_dimension_numbers<[1], [0], [0], [1], [0, 0, 1, 1], [], []>} : vector<16x32xbf16>, vector<32x128xbf16>, vector<16x128xf32> -> vector<16x128xf32>
    %c0_9 = arith.constant 0 : index
    %c0_10 = arith.constant 0 : index
    %9 = vector.load %arg5[%c0_9, %c0_10] : memref<1x128xf32, #tpu.memory_space<vmem>>, vector<1x128xf32>
    %10 = vector.broadcast %9 : vector<1x128xf32> to vector<16x128xf32>
    %11 = arith.addf %8, %10 : vector<16x128xf32>
    %c0_11 = arith.constant 0 : index
    %c0_12 = arith.constant 0 : index
    %12 = vector.load %arg6[%c0_11, %c0_12] : memref<32x128xbf16, #tpu.memory_space<vmem>>, vector<32x128xbf16>
    %cst_13 = arith.constant dense<0.000000e+00> : vector<16x128xf32>
    %13 = tpu.matmul %1, %12, %cst_13 {dimension_numbers = #tpu.dot_dimension_numbers<[1], [0], [0], [1], [0, 0, 1, 1], [], []>} : vector<16x32xbf16>, vector<32x128xbf16>, vector<16x128xf32> -> vector<16x128xf32>
    %cst_14 = arith.constant 0.000000e+00 : f32
    %14 = vector.broadcast %cst_14 : f32 to vector<16x128xf32>
    %15 = arith.cmpf ogt, %6, %14 : vector<16x128xf32>
    %cst_15 = arith.constant 1.000000e+00 : f32
    %16 = vector.broadcast %cst_15 : f32 to vector<16x128xf32>
    %17 = arith.addf %6, %16 : vector<16x128xf32>
    %18 = math.exp %6 : vector<16x128xf32>
    %19 = arith.select %15, %17, %18 : vector<16x128xi1>, vector<16x128xf32>
    %cst_16 = arith.constant 0.000000e+00 : f32
    %20 = vector.broadcast %cst_16 : f32 to vector<16x128xf32>
    %21 = arith.cmpf ogt, %11, %20 : vector<16x128xf32>
    %cst_17 = arith.constant 1.000000e+00 : f32
    %22 = vector.broadcast %cst_17 : f32 to vector<16x128xf32>
    %23 = arith.addf %11, %22 : vector<16x128xf32>
    %24 = math.exp %11 : vector<16x128xf32>
    %25 = arith.select %21, %23, %24 : vector<16x128xi1>, vector<16x128xf32>
    %26 = tpu.iota {dimensions = array<i32: 1>} : vector<16x128xi32>
    %c32_i32 = arith.constant 32 : i32
    %27 = vector.broadcast %c32_i32 : i32 to vector<16x128xi32>
    %28 = arith.cmpi slt, %26, %27 : vector<16x128xi32>
    %cst_18 = arith.constant 0.000000e+00 : f32
    %29 = vector.broadcast %cst_18 : f32 to vector<16x128xf32>
    %30 = arith.select %28, %19, %29 : vector<16x128xi1>, vector<16x128xf32>
    %31 = arith.truncf %30 : vector<16x128xf32> to vector<16x128xbf16>
    %32 = arith.truncf %25 : vector<16x128xf32> to vector<16x128xbf16>
    %33 = arith.truncf %13 : vector<16x128xf32> to vector<16x128xbf16>
    %34 = vector.extract_strided_slice %31 {offsets = [0, 0], sizes = [6, 128], strides = [1, 1]} : vector<16x128xbf16> to vector<6x128xbf16>
    %35 = vector.extract_strided_slice %33 {offsets = [0, 0], sizes = [6, 128], strides = [1, 1]} : vector<16x128xbf16> to vector<6x128xbf16>
    %36 = vector.extract_strided_slice %32 {offsets = [0, 0], sizes = [6, 128], strides = [1, 1]} : vector<16x128xbf16> to vector<6x128xbf16>
    %cst_19 = arith.constant dense<0.000000e+00> : vector<128x128xf32>
    %37 = tpu.matmul %34, %35, %cst_19 {dimension_numbers = #tpu.dot_dimension_numbers<[0], [0], [1], [1], [0, 1, 1, 1], [], []>} : vector<6x128xbf16>, vector<6x128xbf16>, vector<128x128xf32> -> vector<128x128xf32>
    %38 = arith.truncf %37 : vector<128x128xf32> to vector<128x128xbf16>
    %cst_20 = arith.constant dense<0.000000e+00> : vector<6x128xf32>
    %39 = tpu.matmul %36, %38, %cst_20 {dimension_numbers = #tpu.dot_dimension_numbers<[1], [0], [0], [1], [0, 0, 1, 1], [], []>} : vector<6x128xbf16>, vector<128x128xbf16>, vector<6x128xf32> -> vector<6x128xf32>
    %c0_21 = arith.constant 0 : index
    %c0_22 = arith.constant 0 : index
    %c0_23 = arith.constant 0 : index
    %40 = vector.load %arg7[%c0_21, %c0_22, %c0_23] : memref<1x16x128xf32, #tpu.memory_space<vmem>>, vector<1x6x128xf32>
    %41 = vector.shape_cast %40 : vector<1x6x128xf32> to vector<6x128xf32>
    %42 = vector.shape_cast %39 : vector<6x128xf32> to vector<1x6x128xf32>
    tpu.vector_store %arg7[%c0_21, %c0_22, %c0_23], %42 {strides = array<i32>} : memref<1x16x128xf32, #tpu.memory_space<vmem>>, vector<1x6x128xf32>,
    %43 = vector.extract_strided_slice %31 {offsets = [6, 0], sizes = [10, 128], strides = [1, 1]} : vector<16x128xbf16> to vector<10x128xbf16>
    %44 = vector.extract_strided_slice %33 {offsets = [6, 0], sizes = [10, 128], strides = [1, 1]} : vector<16x128xbf16> to vector<10x128xbf16>
    %45 = vector.extract_strided_slice %32 {offsets = [6, 0], sizes = [10, 128], strides = [1, 1]} : vector<16x128xbf16> to vector<10x128xbf16>
    %cst_24 = arith.constant dense<0.000000e+00> : vector<128x128xf32>
    %46 = tpu.matmul %43, %44, %cst_24 {dimension_numbers = #tpu.dot_dimension_numbers<[0], [0], [1], [1], [0, 1, 1, 1], [], []>} : vector<10x128xbf16>, vector<10x128xbf16>, vector<128x128xf32> -> vector<128x128xf32>
    %47 = arith.truncf %46 : vector<128x128xf32> to vector<128x128xbf16>
    %cst_25 = arith.constant dense<0.000000e+00> : vector<10x128xf32>
    %48 = tpu.matmul %45, %47, %cst_25 {dimension_numbers = #tpu.dot_dimension_numbers<[1], [0], [0], [1], [0, 0, 1, 1], [], []>} : vector<10x128xbf16>, vector<128x128xbf16>, vector<10x128xf32> -> vector<10x128xf32>
    %c0_26 = arith.constant 0 : index
    %c6 = arith.constant 6 : index
    %c0_27 = arith.constant 0 : index
    %49 = vector.load %arg7[%c0_26, %c6, %c0_27] : memref<1x16x128xf32, #tpu.memory_space<vmem>>, vector<1x10x128xf32>
    %50 = vector.shape_cast %49 : vector<1x10x128xf32> to vector<10x128xf32>
    %51 = vector.shape_cast %48 : vector<10x128xf32> to vector<1x10x128xf32>
    tpu.vector_store %arg7[%c0_26, %c6, %c0_27], %51 {strides = array<i32>} : memref<1x16x128xf32, #tpu.memory_space<vmem>>, vector<1x10x128xf32>,
    return
  }
  func.func @transform_0(%arg0: i32) -> (i32, i32, i32) {
    %c0_i32 = arith.constant 0 : i32
    %c0_i32_0 = arith.constant 0 : i32
    %c0_i32_1 = arith.constant 0 : i32
    return %arg0, %c0_i32, %c0_i32_0 : i32, i32, i32
  }
  func.func @transform_1(%arg0: i32) -> (i32, i32) {
    %c0_i32 = arith.constant 0 : i32
    %c0_i32_0 = arith.constant 0 : i32
    %c0_i32_1 = arith.constant 0 : i32
    return %c0_i32, %c0_i32_0 : i32, i32
  }
  func.func @transform_2(%arg0: i32) -> (i32, i32) {
    %c0_i32 = arith.constant 0 : i32
    %c0_i32_0 = arith.constant 0 : i32
    %c0_i32_1 = arith.constant 0 : i32
    return %c0_i32, %c0_i32_0 : i32, i32
  }
  func.func @transform_3(%arg0: i32) -> (i32, i32) {
    %c0_i32 = arith.constant 0 : i32
    %c0_i32_0 = arith.constant 0 : i32
    %c0_i32_1 = arith.constant 0 : i32
    return %c0_i32, %c0_i32_0 : i32, i32
  }
  func.func @transform_4(%arg0: i32) -> (i32, i32) {
    %c0_i32 = arith.constant 0 : i32
    %c0_i32_0 = arith.constant 0 : i32
    %c0_i32_1 = arith.constant 0 : i32
    return %c0_i32, %c0_i32_0 : i32, i32
  }
  func.func @transform_5(%arg0: i32) -> (i32, i32) {
    %c0_i32 = arith.constant 0 : i32
    %c0_i32_0 = arith.constant 0 : i32
    %c0_i32_1 = arith.constant 0 : i32
    return %c0_i32, %c0_i32_0 : i32, i32
  }
  func.func @transform_6(%arg0: i32) -> (i32, i32, i32) {
    %c0_i32 = arith.constant 0 : i32
    %c0_i32_0 = arith.constant 0 : i32
    %c0_i32_1 = arith.constant 0 : i32
    return %arg0, %c0_i32, %c0_i32_0 : i32, i32, i32
  }
}

</mosaic_0001>

<bundles_post_ra>
// kernel: tpu_custom_call.1
= control target key start
LH: loop header
LB: loop body
LE: loop exit
PB: predicated region body
PF: predicated region fallthrough
CT: control target
= control target key end

     0   :  { %11 = vsyncpa [#allocation3], 0  ;;  %s1843_s0 = inlined_call_operand.hbm [shape: bf16[2,16,32], index: 0, kind: input, shape index: {}]   ;;  %s1844_s1 = inlined_call_operand.hbm [shape: bf16[32,128], index: 1, kind: input, shape index: {}]   ;;  %s1845_s2 = inlined_call_operand.vmem [shape: f32[1,128], index: 2, kind: input, shape index: {}]   ;;  %s1846_s3 = inlined_call_operand.hbm [shape: bf16[32,128], index: 3, kind: input, shape index: {}]   ;;  %s1847_s4 = inlined_call_operand.vmem [shape: f32[1,128], index: 4, kind: input, shape index: {}]   ;;  %s1848_s5 = inlined_call_operand.hbm [shape: bf16[32,128], index: 5, kind: input, shape index: {}]   ;;  %s1849_s6 = inlined_call_operand.hbm [shape: f32[2,16,128], index: 6, kind: output, shape index: {}]  }
   0x1   :  { %13 = vsyncpa [#allocation3 + $0x1], 0 }
   0x2   :  { %14 = vsyncpa [#allocation6], 0 }
   0x3   :  { %15 = vsyncpa [#allocation9], 0 }
   0x4   :  { %16 = vsyncpa [#allocation4], 0 }
   0x5   :  { %18 = vsyncpa [#allocation4 + $0x1], 0  ;;  %s1569_s21 = smov 0   ;;  %s1571_s22 = smov 0  }
   0x6   :  { %s1573_s23 = smov 0   ;;  %s1575_s24 = smov 0  }
   0x7 LB: > { %s1590_s25 = sadd.s32 4294967295, %s1521_s24   ;;  %s1047_s26 = sadd.s32 4294967294, %s1521_s24   ;;  %s1521_s24 = sphi %s1575_s24, %s1876_s24   ;;  %s1517_s23 = sphi %s1573_s23, %s1875_s23   ;;  %s1513_s22 = sphi %s1571_s22, %s1874_s22   ;;  %s1509_s21 = sphi %s1569_s21, %s1873_s21  }
   0x8   : > { %p44_p0 = scmp.ne.s32.totalorder %s1513_s22, %s1509_s21  ;;  %p1850_p1 = scmp.eq.s32.totalorder %s1590_s25, 0 }
   0x9   : > { %p173_p2 = scmp.eq.s32.totalorder %s1590_s25, 1  ;;  %p179_p3 = scmp.eq.s32.totalorder %s1047_s26, 1 }
   0xa   : > { %p1599_p4 = por %p1850_p1, %p44_p0  ;;  %p1048_p5 = scmp.ge.s32.totalorder %s1521_s24, 1 }
   0xb   : > { %p1604_p6 = por %p179_p3, %p44_p0  ;;  %p186_p7 = scmp.lt.s32.totalorder %s1521_s24, 3 }
   0xc   : > { %s1856_s27 = scalar_select %p1599_p4, 1, 0 }
   0xd   : > { %s1857_s28 = scalar_select %p1604_p6, 1, 0 }
   0xe   : > { %p1609_p8 = pnand %p1048_p5, %p186_p7  ;;  %s1523_s30 = smov [#allocation5]  }
   0xf   : > { %s198_s7 = sshll.u32 %s1523_s30, 4  ;;  %s1524_s9 = smov [#allocation7]   ;;  %s199_s7 = int_to_ptr.vmem [resolvable:$true] %s198_s7 }
  0x10   : > { %s1858_s29 = scalar_select %p1609_p8, 1, 0 }
  0x11   : > { %p1260_p9 = pneg %p1609_p8  ;;  %s214_s10 = sshll.u32 %s1524_s9, 4  ;;  %s215_s10 = int_to_ptr.vmem [resolvable:$true] %s214_s10 }
  0x12   : > { %s1525_s11 = smov [#allocation8]   ;;  %s1354_s13 = scalar_lea.vmem %s199_s7, 256 }
  0x13   : > { %p1618_p11 = pnand %p1260_p9, %p1850_p1  ;;  %s230_s12 = sshll.u32 %s1525_s11, 4  ;;  %s231_s12 = int_to_ptr.vmem [resolvable:$true] %s230_s12 }
  0x14   : > { %p1355_p13 = scmp.ne.s32.totalorder %s199_s7, %s1354_s13  ;;  %p1362_p5 = scmp.lt.s32.totalorder %s199_s7, %s199_s7 }
  0x15   : > { %p1345_p12 = pneg %p1618_p11  ;;  %p1363_p7 = scmp.lt.s32.totalorder %s1354_s13, %s1354_s13 }
  0x17   : > { %p1357_p0 = pnand %p1355_p13, %p1345_p12  ;;  %p1364_p9 = por %p1363_p7, %p1362_p5 }
  0x19   : > { %p1358_p3 = pneg %p1357_p0 }
  0x1b   : > { %p1365_p10 = pnand %p1364_p9, %p1358_p3 }
  0x1d   : > { %1368 = shalt.err (!%p1365_p10)
}
  0x1e   : > { %s1851_s14 = smov 64   ;;  %s1852_s15 = smov 4  }
  0x1f   : > { %1263 = dma.hbm_to_vmem [thread:$0]  (!%p1618_p11), %s1844_s1, 256, %s199_s7, [#allocation6], %s1851_s14, %s1851_s14, %s1852_s15  }
  0x20   : > { %s1380_s18 = scalar_lea.vmem %s215_s10, 256  ;;  %p1388_p3 = scmp.lt.s32.totalorder %s215_s10, %s215_s10 }
  0x21   : > { %p1381_p13 = scmp.ne.s32.totalorder %s215_s10, %s1380_s18  ;;  %p1389_p10 = scmp.lt.s32.totalorder %s1380_s18, %s1380_s18 }
  0x23   : > { %p1383_p0 = pnand %p1381_p13, %p1345_p12  ;;  %p1390_p7 = por %p1389_p10, %p1388_p3 }
  0x25   : > { %p1384_p5 = pneg %p1383_p0 }
  0x27   : > { %p1391_p9 = pnand %p1390_p7, %p1384_p5 }
  0x29   : > { %1394 = shalt.err (!%p1391_p9)
}
  0x2a   : > { %1266 = dma.hbm_to_vmem [thread:$0]  (!%p1618_p11), %s1846_s3, 256, %s215_s10, [#allocation6], %s1851_s14, %s1851_s14, %s1852_s15  }
  0x2b   : > { %s1406_s26 = scalar_lea.vmem %s231_s12, 256  ;;  %p1414_p3 = scmp.lt.s32.totalorder %s231_s12, %s231_s12 }
  0x2c   : > { %p1407_p1 = scmp.ne.s32.totalorder %s231_s12, %s1406_s26  ;;  %p1415_p5 = scmp.lt.s32.totalorder %s1406_s26, %s1406_s26 }
  0x2e   : > { %p1409_p13 = pnand %p1407_p1, %p1345_p12  ;;  %p1416_p10 = por %p1415_p5, %p1414_p3 }
  0x30   : > { %p1410_p0 = pneg %p1409_p13 }
  0x32   : > { %p1417_p7 = pnand %p1416_p10, %p1410_p0 }
  0x34   : > { %1420 = shalt.err (!%p1417_p7)
}
  0x35   : > { %1269 = dma.hbm_to_vmem [thread:$0]  (!%p1618_p11), %s1848_s5, 256, %s231_s12, [#allocation9], %s1851_s14, %s1851_s14, %s1852_s15  }
  0x36   : > { %s1658_s9 = sadd.s32 1, %s1521_s24   ;;  %s31_s10 = sadd.s32 1, %s1517_s23 }
  0x37   : > { %s28_s8 = ssub.s32 %s1521_s24, %s1658_s9  ;;  %p38_p12 = scmp.ne.s32.totalorder %s1517_s23, %s1513_s22 }
  0x38   : > { %p29_p1 = scmp.eq.s32.totalorder %s28_s8, 0  ;;  %p39_p9 = scmp.eq.s32.totalorder %s1521_s24, 0 }
  0x39   : > { %p1281_p13 = scmp.lt.s32.totalorder %s1521_s24, 2  ;;  %p1672_p3 = por %p173_p2, %p38_p12 }
  0x3a   : > { %s1668_s11 = scalar_select %p29_p1, %s1517_s23, %s31_s10  }
  0x3b   : > { %p40_p0 = por %p39_p9, %p38_p12  ;;  %s244_s16 = sand.u32 1, %s1517_s23  }
  0x3c   : > { %s1860_s13 = scalar_select %p1672_p3, 1, 0 }
  0x3d   : > { %s1095_s17 = sshll.u32 %s1521_s24, 7  ;;  %s1053_s12 = sshll.u32 %s244_s16, 3 }
  0x3e   : > { %s1681_s20 = scalar_lea.hbm %s1843_s0, %s1095_s17  ;;  %s248_s26 = scalar_lea.vmem [#allocation2], %s1053_s12 }
  0x3f   : > { %s255_s30 = sshll.u32 %s248_s26, 4  ;;  %p1683_p11 = pnand %p1281_p13, %p40_p0  ;;  %s1687_s30 = int_to_ptr.vmem [resolvable:$true] %s255_s30 }
  0x40   : > { %s1689_s8 = scalar_lea.sflag [#allocation3], %s244_s16  ;;  %s1421_s10 = scalar_lea.hbm %s1681_s20, 128 }
  0x41   : > { %p1422_p2 = scmp.ne.s32.totalorder %s1681_s20, %s1421_s10  ;;  %p1423_p5 = pneg %p1683_p11 }
  0x42   : > { %s1426_s12 = scalar_lea.hbm %s1843_s0, 256  ;;  %p1427_p1 = scmp.lt.s32.totalorder %s1681_s20, %s1843_s0 }
  0x43   : > { %p1424_p10 = pnand %p1423_p5, %p1422_p2  ;;  %p1428_p12 = scmp.lt.s32.totalorder %s1426_s12, %s1421_s10 }
  0x45   : > { %p1425_p7 = pneg %p1424_p10  ;;  %p1429_p9 = por %p1428_p12, %p1427_p1 }
  0x47   : > { %p1430_p13 = pnand %p1429_p9, %p1425_p7 }
  0x49   : > { %1433 = shalt.err (!%p1430_p13)
}
  0x4a   : > { %s1434_s16 = scalar_lea.vmem %s1687_s30, 128  ;;  %s1528_s14 = smov [#allocation2]  }
  0x4b   : > { %p1435_p0 = scmp.ne.s32.totalorder %s1687_s30, %s1434_s16  ;;  %s1439_s15 = sshll.u32 %s1528_s14, 4  ;;  %s1440_s15 = int_to_ptr.vmem [resolvable:$false] %s1439_s15 }
  0x4c   : > { %s1441_s17 = scalar_lea.vmem %s1440_s15, 256  ;;  %p1442_p10 = scmp.lt.s32.totalorder %s1687_s30, %s1440_s15 }
  0x4d   : > { %p1437_p6 = pnand %p1435_p0, %p1423_p5  ;;  %p1443_p3 = scmp.lt.s32.totalorder %s1441_s17, %s1434_s16 }
  0x4f   : > { %p1438_p2 = pneg %p1437_p6  ;;  %p1444_p4 = por %p1443_p3, %p1442_p10 }
  0x51   : > { %p1445_p8 = pnand %p1444_p4, %p1438_p2 }
  0x53   : > { %1448 = shalt.err (!%p1445_p8)
}
  0x54   : > { %s1862_s10 = smov 4   ;;  %s1863_s18 = smov 64  }
  0x55   : > { %1273 = dma.hbm_to_vmem [thread:$0]  (!%p1683_p11), %s1681_s20, 128, %s1687_s30, %s1689_s8, %s1863_s18, %s1863_s18, %s1862_s10  }
  0x56   : > { %p1864_p6 = scmp.ne.s32.totalorder %s1858_s29, 0 }
  0x57   : > { %s1716_s14 = sand.u32 (!%p1864_p6), 1, %s1513_s22   ;;  %p1865_p4 = scmp.ne.s32.totalorder (!%p1864_p6), %s1856_s27, 0 }
  0x58   : > { %267 = sbr.rel (%p1864_p6) target bundleno = 931 (0x3a3), region = 44  ;;  %s1057_s15 = sshll.u32 (!%p1864_p6), %s1716_s14, 3 }
  0x59   : > { %s270_s12 = scalar_lea.sflag (!%p1864_p6), [#allocation3], %s1716_s14  ;;  %s273_s19 = scalar_lea.vmem (!%p1864_p6), [#allocation2], %s1057_s15 }
  0x5d   : > { %1492 = dma.done.wait (%p1865_p4), %s270_s12, 128  }
  0x5e   : > { %1494 = vsyncadd (%p1865_p4), %s270_s12, 4294967168  ;;  %p1866_p8 = scmp.eq.s32.totalorder %s1590_s25, 0 }
  0x60   : > { %1496 = dma.done.wait (%p1866_p8), [#allocation6], 512   ;;  %p1867_p3 = pmov %p1866_p8 }
  0x62   : > { %1498 = vsyncadd (%p1867_p3), [#allocation6], 4294966784  ;;  %p1868_p11 = pmov %p1867_p3 }
  0x63   : > { %p1869_p5 = pmov %p1867_p3 }
  0x64   : > { %1500 = dma.done.wait (%p1868_p11), [#allocation9], 256  }
  0x65   : > { %1502 = vsyncadd (%p1869_p5), [#allocation9], 4294967040  ;;  %v1529_v0 = vmov 0.0   ;;  %vm1530_vm0 = vmmov 0   ;;  %v1328_v1 = vld [vmem:[#allocation5 + $0x8] sm:$0xff]   ;;  %v1329_v2 = vld [vmem:[#allocation5] sm:$0xff]   ;;  %v531_v20 = vlaneseq }
  0x66   : > { %1142 = vmatprep.subr.bf16.mxu0 %v1529_v0  ;;  %1146 = vmatprep.mubr.msk.bf16.mxu0 %vm1530_vm0, %v1529_v0  ;;  %v1330_v3 = vld [vmem:[%s273_s19] sm:$0xff]   ;;  %vm345_vm1 = vcmask 261120   ;;  %v1331_v4 = vld [vmem:[#allocation8 + $0x8] sm:$0xff]   ;;  %v1332_v5 = vld [vmem:[#allocation8] sm:$0xff]   ;;  %vm580_vm2 = vcmask 1042432   ;;  %vm776_vm3 = vcmask 1044480  }
  0x67   : > { %1150 = vmatprep.subr.bf16.mxu1 %v1529_v0  ;;  %1154 = vmatprep.mubr.msk.bf16.mxu1 %vm1530_vm0, %v1529_v0  ;;  %v1333_v6 = vld [vmem:[#allocation7 + $0x8] sm:$0xff]   ;;  %v1334_v7 = vld [vmem:[#allocation7] sm:$0xff]   ;;  %v532_v25 = vand.u32 127, %v531_v20  ;;  %vm555_vm7 = vcmask 48128   ;;  %vm751_vm8 = vcmask 80896   ;;  %s1061_s7 = sshll.u32 %s1716_s14, 4 }
  0x68   : > { %1143 = vmatpush3.bf16.msra.mxu0 %v1328_v1  ;;  %1151 = vmatpush3.bf16.msra.mxu1 %v1333_v6  ;;  %v1062_v8 = vld [vmem:[%s1845_s2] ss:$0 sm:$0xff]  ;;  %s313_s8 = scalar_lea.vmem [#allocation10], %s1061_s7  ;;  %s1096_s16 = sshll.u32 %s1590_s25, 8 }
  0x69   : > { %1144 = vmatprep.subr.bf16.mxu0 %v1529_v0  ;;  %1152 = vmatprep.subr.bf16.mxu1 %v1529_v0  ;;  %vm533_vm5 = vcmp.lt.s32.totalorder %v532_v25, 32  ;;  %v1067_v51 = vld [vmem:[%s1847_s4] ss:$0 sm:$0xff]  ;;  %s945_s26 = sshll.u32 %s313_s8, 4  ;;  %s1800_s18 = scalar_lea.hbm %s1849_s6, %s1096_s16  ;;  %s1795_s26 = int_to_ptr.vmem [resolvable:$true] %s945_s26 }
  0x6a   : > { %s932_s15 = scalar_lea.sflag [#allocation4], %s1716_s14  ;;  %s1449_s12 = scalar_lea.vmem %s1795_s26, 256 }
  0x6b   : > { %p1450_p7 = scmp.ne.s32.totalorder %s1795_s26, %s1449_s12  ;;  %p1870_p1 = scmp.ne.s32.totalorder %s1860_s13, 0 }
  0x6c   : > { %1145 = vmatpush3.bf16.msra.mxu0 %v1329_v2  ;;  %1153 = vmatpush3.bf16.msra.mxu1 %v1334_v7  ;;  %s1531_s25 = smov [#allocation10]  }
  0x6d   : > { %1158 = vmatprep.subr.bf16.mxu0 %v1529_v0  ;;  %p1451_p12 = pnand %p1450_p7, %p1870_p1  ;;  %s1453_s19 = sshll.u32 %s1531_s25, 4  ;;  %s1454_s19 = int_to_ptr.vmem [resolvable:$false] %s1453_s19 }
  0x6e   : > { %s1455_s27 = scalar_lea.vmem %s1454_s19, 512  ;;  %p1456_p13 = scmp.lt.s32.totalorder %s1795_s26, %s1454_s19 }
  0x6f   : > { %1147 = vmatmul.mubr.msk.bf16.vlgmr.msra.gmra.mxu0 %vm345_vm1, %v1330_v3  ;;  %1155 = vmatmul.mubr.msk.bf16.vlgmr.msra.gmra.mxu1 %vm345_vm1, %v1330_v3  ;;  %p1452_p9 = pneg %p1451_p12  ;;  %p1457_p0 = scmp.lt.s32.totalorder %s1455_s27, %s1449_s12 }
  0x70   : > { %1159 = vmatpush3.bf16.msra.mxu0 %v1331_v4  ;;  %1162 = vmatprep.mubr.msk.bf16.mxu0 %vm1530_vm0, %v1529_v0 }
  0x71   : > { %1160 = vmatprep.subr.bf16.mxu0 %v1529_v0  ;;  %p1458_p2 = por %p1457_p0, %p1456_p13 }
  0x73   : > { %p1459_p10 = pnand %p1458_p2, %p1452_p9 }
  0x74   : > { %1161 = vmatpush3.bf16.msra.mxu0 %v1332_v5 }
  0x75   : > { %1184 = vmatprep.subr.bf16.mxu0 %v1529_v0 }
  0x77   : > { %1163 = vmatmul.mubr.msk.bf16.vlgmr.msra.gmra.mxu0 %vm345_vm1, %v1330_v3 }
  0x78   : > { %1200 = vmatprep.mubr.msk.bf16.mxu0 %vm1530_vm0, %v1529_v0 }
 0x12f   : > { %v383_v9 = vpop.f32.mrf.mxu0  ;;  %v447_v39 = vpop.f32.mrf.mxu1 }
 0x130   : > { %v384_v10 = vadd.f32 %v1062_v8, %v383_v9  ;;  %v448_v52 = vadd.f32 %v1067_v51, %v447_v39 }
 0x131   : > { %v1148_v11 = vpop.f32.mrf.mxu0  ;;  %v1156_v40 = vpop.f32.mrf.mxu1 }
 0x132   : > { %v515_v12 = vmul.f32 1.442695, %v384_v10  ;;  %v513_v28 = vadd.f32 1.0, %v384_v10  ;;  %vm511_vm4 = vcmp.gt.f32.partialorder %v384_v10, 0.0  ;;  %v525_v55 = vmul.f32 1.442695, %v448_v52 }
 0x133   : > { %v386_v13 = vpop.f32.mrf.mxu0  ;;  %v450_v42 = vpop.f32.mrf.mxu1  ;;  %v523_v63 = vadd.f32 1.0, %v448_v52  ;;  %vm521_vm9 = vcmp.gt.f32.partialorder %v448_v52, 0.0 }
 0x134   : > { %1335 = vpow2.f32 %v515_v12  ;;  %v387_v14 = vadd.f32 %v1062_v8, %v386_v13  ;;  %v451_v54 = vadd.f32 %v1067_v51, %v450_v42 }
 0x135   : > { %v1149_v15 = vpop.f32.mrf.mxu0  ;;  %v1157_v43 = vpop.f32.mrf.mxu1 }
 0x136   : > { %v517_v16 = vmul.f32 1.442695, %v387_v14  ;;  %v514_v29 = vadd.f32 1.0, %v387_v14  ;;  %vm512_vm6 = vcmp.gt.f32.partialorder %v387_v14, 0.0  ;;  %v527_v57 = vmul.f32 1.442695, %v451_v54 }
 0x137   : > { %v504_v17 = vpop.f32.mrf.mxu0  ;;  %v524_v1 = vadd.f32 1.0, %v451_v54  ;;  %vm522_vm10 = vcmp.gt.f32.partialorder %v451_v54, 0.0 }
 0x138   : > { %1337 = vpow2.f32 %v517_v16 }
 0x139   : > { %v1164_v18 = vpop.f32.mrf.mxu0  ;;  %1339 = vpow2.f32 %v525_v55 }
 0x13a   : > { %1341 = vpow2.f32 %v527_v57 }
 0x13b   : > { %v507_v19 = vpop.f32.mrf.mxu0 }
 0x13c   : > { %v538_v21 = vpack.c.bf16 %v507_v19, %v504_v17 }
 0x13d   : > { %v1165_v22 = vpop.f32.mrf.mxu0 }
 0x13e   : > { %v750_v23 = vrot.slane %v538_v21, 3  ;;  %1242 = vmatprep.subr.msk.bf16.mxu1 %vm580_vm2, %v538_v21  ;;  %v582_v24 = vsel %vm580_vm2, %v538_v21, 0 }
 0x13f   : > { %1167 = vmatpush3.bf16.msra.mxu1 %v582_v24 }
 0x140   : > { %1243 = vmatprep.subr.msk.bf16.mxu1 %vm776_vm3, %v750_v23  ;;  %v778_v26 = vsel %vm776_vm3, %v750_v23, 0 }
 0x141   : > { %v1336_v27 = vpop.eup %1335 }
 0x142   : > { %v519_v30 = vsel %vm511_vm4, %v513_v28, %v1336_v27 }
 0x143   : > { %v534_v33 = vsel %vm533_vm5, %v519_v30, 0.0 }
 0x145   : > { %v1338_v31 = vpop.eup %1337 }
 0x146   : > { %v520_v32 = vsel %vm512_vm6, %v514_v29, %v1338_v31  ;;  %v1340_v61 = vpop.eup %1339 }
 0x147   : > { %v535_v34 = vsel %vm533_vm5, %v520_v32, 0.0  ;;  %v1342_v2 = vpop.eup %1341  ;;  %v529_v3 = vsel %vm521_vm9, %v523_v63, %v1340_v61 }
 0x148   : > { %v536_v35 = vpack.c.bf16 %v535_v34, %v534_v33  ;;  %v530_v4 = vsel %vm522_vm10, %v524_v1, %v1342_v2 }
 0x149   : > { %v1772_v5 = vpack.c.bf16 %v530_v4, %v529_v3 }
 0x14a   : > { %539 = vxpose.xlu0.c.b16.start.end [1/1] (short) %v536_v35, 128  ;;  %v731_v36 = vrot.slane %v536_v35, 3 }
 0x14b   : > { %v886_v54 = vrot.slane %v1772_v5, 3 }
 0x167   : > { %733 = vxpose.xlu0.c.b16.start.end [1/1] (short) %v731_v36, 128 }
 0x1ac   : > { %v547_v37 = vpop.trf.xlu0 }
 0x1ad   : > { %1168 = vmatprep.mubr.msk.bf16.mxu1 %vm555_vm7, %v547_v37 }
 0x1b0   : > { %v548_v38 = vpop.trf.xlu0 }
 0x1b1   : > { %1169 = vmatmul.mubr.msk.bf16.vlgmr.msra.gmra.mxu1 %vm555_vm7, %v548_v38 }
 0x1b2   : > { %1205 = vmatpush3.bf16.msra.mxu1 %v778_v26 }
 0x1b4   : > { %v549_v41 = vpop.trf.xlu0 }
 0x1b5   : > { %1172 = vmatprep.mubr.msk.bf16.mxu1 %vm555_vm7, %v549_v41 }
 0x1b8   : > { %v550_v44 = vpop.trf.xlu0 }
 0x1b9   : > { %1173 = vmatmul.mubr.msk.bf16.gmra.mxu1 %vm555_vm7, %v550_v44 }
 0x1bc   : > { %v551_v45 = vpop.trf.xlu0 }
 0x1bd   : > { %1176 = vmatprep.mubr.msk.bf16.mxu1 %vm555_vm7, %v551_v45 }
 0x1c0   : > { %v552_v46 = vpop.trf.xlu0 }
 0x1c1   : > { %1177 = vmatmul.mubr.msk.bf16.gmra.mxu1 %vm555_vm7, %v552_v46 }
 0x1c4   : > { %v553_v47 = vpop.trf.xlu0 }
 0x1c5   : > { %1180 = vmatprep.mubr.msk.bf16.mxu1 %vm555_vm7, %v553_v47 }
 0x1c8   : > { %v554_v48 = vpop.trf.xlu0 }
 0x1c9   : > { %1181 = vmatmul.mubr.msk.bf16.gmra.mxu1 %vm555_vm7, %v554_v48 }
 0x1cc   : > { %v741_v49 = vpop.trf.xlu0 }
 0x1cd   : > { %1206 = vmatprep.mubr.msk.bf16.mxu1 %vm751_vm8, %v741_v49 }
 0x1d0   : > { %v742_v50 = vpop.trf.xlu0 }
 0x1d1   : > { %1207 = vmatmul.mubr.msk.bf16.vlgmr.msra.gmra.mxu1 %vm751_vm8, %v742_v50 }
 0x1d4   : > { %v743_v53 = vpop.trf.xlu0 }
 0x1d5   : > { %1210 = vmatprep.mubr.msk.bf16.mxu1 %vm751_vm8, %v743_v53 }
 0x1d8   : > { %v744_v56 = vpop.trf.xlu0 }
 0x1d9   : > { %1211 = vmatmul.mubr.msk.bf16.gmra.mxu1 %vm751_vm8, %v744_v56 }
 0x1dc   : > { %v745_v58 = vpop.trf.xlu0 }
 0x1dd   : > { %1214 = vmatprep.mubr.msk.bf16.mxu1 %vm751_vm8, %v745_v58 }
 0x1e0   : > { %v746_v59 = vpop.trf.xlu0 }
 0x1e1   : > { %1215 = vmatmul.mubr.msk.bf16.gmra.mxu1 %vm751_vm8, %v746_v59 }
 0x1e4   : > { %v747_v60 = vpop.trf.xlu0 }
 0x1e5   : > { %1218 = vmatprep.mubr.msk.bf16.mxu1 %vm751_vm8, %v747_v60 }
 0x1e8   : > { %v748_v62 = vpop.trf.xlu0 }
 0x1e9   : > { %1219 = vmatmul.mubr.msk.bf16.gmra.mxu1 %vm751_vm8, %v748_v62 }
 0x271   : > { %v1170_v6 = vpop.f32.mrf.mxu1 }
 0x273   : > { %v618_v7 = vpop.f32.mrf.mxu1 }
 0x275   : > { %v1171_v8 = vpop.f32.mrf.mxu1 }
 0x276   : > { %v682_v39 = vpack.c.bf16 %v1171_v8, %v1170_v6 }
 0x277   : > { %v621_v9 = vpop.f32.mrf.mxu1 }
 0x278   : > { %v681_v42 = vpack.c.bf16 %v621_v9, %v618_v7 }
 0x279   : > { %v1174_v10 = vpop.f32.mrf.mxu1 }
 0x27b   : > { %v634_v11 = vpop.f32.mrf.mxu1 }
 0x27d   : > { %v1175_v12 = vpop.f32.mrf.mxu1 }
 0x27e   : > { %v684_v33 = vpack.c.bf16 %v1175_v12, %v1174_v10 }
 0x27f   : > { %v637_v13 = vpop.f32.mrf.mxu1 }
 0x280   : > { %v683_v36 = vpack.c.bf16 %v637_v13, %v634_v11 }
 0x281   : > { %v1178_v14 = vpop.f32.mrf.mxu1 }
 0x283   : > { %v650_v15 = vpop.f32.mrf.mxu1 }
 0x285   : > { %v1179_v16 = vpop.f32.mrf.mxu1 }
 0x286   : > { %v686_v27 = vpack.c.bf16 %v1179_v16, %v1178_v14 }
 0x287   : > { %v653_v17 = vpop.f32.mrf.mxu1 }
 0x288   : > { %v685_v30 = vpack.c.bf16 %v653_v17, %v650_v15 }
 0x289   : > { %v1182_v18 = vpop.f32.mrf.mxu1 }
 0x28b   : > { %v666_v19 = vpop.f32.mrf.mxu1 }
 0x28d   : > { %v1183_v20 = vpop.f32.mrf.mxu1 }
 0x28e   : > { %v688_v21 = vpack.c.bf16 %v1183_v20, %v1182_v18 }
 0x28f   : > { %v669_v22 = vpop.f32.mrf.mxu1 }
 0x290   : > { %1185 = vmatpush3.bf16.msra.mxu0 %v688_v21  ;;  %v687_v24 = vpack.c.bf16 %v669_v22, %v666_v19 }
 0x291   : > { %v1208_v23 = vpop.f32.mrf.mxu1  ;;  %1186 = vmatprep.subr.bf16.mxu0 %v1529_v0 }
 0x293   : > { %v814_v25 = vpop.f32.mrf.mxu1 }
 0x294   : > { %1187 = vmatpush3.bf16.msra.mxu0 %v687_v24 }
 0x295   : > { %v1209_v26 = vpop.f32.mrf.mxu1  ;;  %1188 = vmatprep.subr.bf16.mxu0 %v1529_v0 }
 0x296   : > { %v878_v52 = vpack.c.bf16 %v1209_v26, %v1208_v23 }
 0x297   : > { %v817_v28 = vpop.f32.mrf.mxu1 }
 0x298   : > { %1189 = vmatpush3.bf16.msra.mxu0 %v686_v27  ;;  %v877_v53 = vpack.c.bf16 %v817_v28, %v814_v25 }
 0x299   : > { %v1212_v29 = vpop.f32.mrf.mxu1  ;;  %1190 = vmatprep.subr.bf16.mxu0 %v1529_v0 }
 0x29b   : > { %v830_v31 = vpop.f32.mrf.mxu1 }
 0x29c   : > { %1191 = vmatpush3.bf16.msra.mxu0 %v685_v30 }
 0x29d   : > { %v1213_v32 = vpop.f32.mrf.mxu1  ;;  %1192 = vmatprep.subr.bf16.mxu0 %v1529_v0 }
 0x29e   : > { %v880_v50 = vpack.c.bf16 %v1213_v32, %v1212_v29 }
 0x29f   : > { %v833_v34 = vpop.f32.mrf.mxu1 }
 0x2a0   : > { %1193 = vmatpush3.bf16.msra.mxu0 %v684_v33  ;;  %v879_v51 = vpack.c.bf16 %v833_v34, %v830_v31 }
 0x2a1   : > { %v1216_v35 = vpop.f32.mrf.mxu1  ;;  %1194 = vmatprep.subr.bf16.mxu0 %v1529_v0 }
 0x2a3   : > { %v846_v37 = vpop.f32.mrf.mxu1 }
 0x2a4   : > { %1195 = vmatpush3.bf16.msra.mxu0 %v683_v36 }
 0x2a5   : > { %v1217_v38 = vpop.f32.mrf.mxu1  ;;  %1196 = vmatprep.subr.bf16.mxu0 %v1529_v0 }
 0x2a6   : > { %v882_v48 = vpack.c.bf16 %v1217_v38, %v1216_v35 }
 0x2a7   : > { %v849_v40 = vpop.f32.mrf.mxu1 }
 0x2a8   : > { %1197 = vmatpush3.bf16.msra.mxu0 %v682_v39  ;;  %v881_v49 = vpack.c.bf16 %v849_v40, %v846_v37 }
 0x2a9   : > { %v1220_v41 = vpop.f32.mrf.mxu1  ;;  %1198 = vmatprep.subr.bf16.mxu0 %v1529_v0 }
 0x2ab   : > { %v862_v43 = vpop.f32.mrf.mxu1 }
 0x2ac   : > { %1199 = vmatpush3.bf16.msra.mxu0 %v681_v42 }
 0x2ad   : > { %v1221_v44 = vpop.f32.mrf.mxu1  ;;  %1222 = vmatprep.subr.bf16.mxu0 %v1529_v0 }
 0x2ae   : > { %v884_v45 = vpack.c.bf16 %v1221_v44, %v1220_v41 }
 0x2af   : > { %1201 = vmatmul.mubr.bf16.vlgmr.msra.gmra.mxu0 %v1772_v5  ;;  %v865_v46 = vpop.f32.mrf.mxu1 }
 0x2b0   : > { %1223 = vmatpush3.bf16.msra.mxu0 %v884_v45  ;;  %1238 = vmatprep.mubr.msk.bf16.mxu0 %vm1530_vm0, %v1529_v0  ;;  %v883_v47 = vpack.c.bf16 %v865_v46, %v862_v43 }
 0x2b1   : > { %1224 = vmatprep.subr.bf16.mxu0 %v1529_v0 }
 0x2b4   : > { %1225 = vmatpush3.bf16.msra.mxu0 %v883_v47 }
 0x2b5   : > { %1226 = vmatprep.subr.bf16.mxu0 %v1529_v0 }
 0x2b8   : > { %1227 = vmatpush3.bf16.msra.mxu0 %v882_v48 }
 0x2b9   : > { %1228 = vmatprep.subr.bf16.mxu0 %v1529_v0 }
 0x2bc   : > { %1229 = vmatpush3.bf16.msra.mxu0 %v881_v49 }
 0x2bd   : > { %1230 = vmatprep.subr.bf16.mxu0 %v1529_v0 }
 0x2c0   : > { %1231 = vmatpush3.bf16.msra.mxu0 %v880_v50 }
 0x2c1   : > { %1232 = vmatprep.subr.bf16.mxu0 %v1529_v0 }
 0x2c4   : > { %1233 = vmatpush3.bf16.msra.mxu0 %v879_v51 }
 0x2c5   : > { %1234 = vmatprep.subr.bf16.mxu0 %v1529_v0 }
 0x2c8   : > { %1235 = vmatpush3.bf16.msra.mxu0 %v878_v52 }
 0x2c9   : > { %1236 = vmatprep.subr.bf16.mxu0 %v1529_v0 }
 0x2cc   : > { %1237 = vmatpush3.bf16.msra.mxu0 %v877_v53 }
 0x2cf   : > { %1239 = vmatmul.mubr.bf16.vlgmr.msra.gmra.mxu0 %v886_v54 }
 0x36f   : > { %v723_v55 = vpop.f32.mrf.mxu0 }
 0x370   : > { %729 = vst [vmem:[%s313_s8] sm:$0x3f] %v723_v55 }
 0x371   : > { %v1202_v56 = vpop.f32.mrf.mxu0 }
 0x373   : > { %v726_v57 = vpop.f32.mrf.mxu0 }
 0x375   : > { %v1203_v58 = vpop.f32.mrf.mxu0 }
 0x38f   : > { %v922_v59 = vpop.f32.mrf.mxu0 }
 0x390   : > { %929 = vst [vmem:[%s313_s8 + $0x6] sm:$0xff] %v922_v59 }
 0x391   : > { %v1240_v0 = vpop.f32.mrf.mxu0 }
 0x393   : > { %v925_v60 = vpop.f32.mrf.mxu0 }
 0x394   : > { %930 = vst [vmem:[%s313_s8 + $0xe] sm:$0x3] %v925_v60 }
 0x395   : > { %v1241_v61 = vpop.f32.mrf.mxu0 }
 0x396   : > { %1462 = shalt.err (!%p1459_p10)
}
 0x397   : > { %s1463_s29 = scalar_lea.hbm %s1800_s18, 256  ;;  %s1467_s7 = scalar_lea.hbm %s1849_s6, 512 }
 0x398   : > { %p1464_p6 = scmp.ne.s32.totalorder %s1800_s18, %s1463_s29  ;;  %p1468_p3 = scmp.lt.s32.totalorder %s1800_s18, %s1849_s6 }
 0x399   : > { %p1469_p11 = scmp.lt.s32.totalorder %s1467_s7, %s1463_s29 }
 0x39a   : > { %p1465_p4 = pnand %p1464_p6, %p1870_p1 }
 0x39b   : > { %p1470_p5 = por %p1469_p11, %p1468_p3 }
 0x39c   : > { %p1466_p8 = pneg %p1465_p4 }
 0x39e   : > { %p1471_p7 = pnand %p1470_p5, %p1466_p8 }
 0x3a0   : > { %1474 = shalt.err (!%p1471_p7)
}
 0x3a1   : > { %s1532_s17 = smov 128   ;;  %s1533_s10 = smov 8  }
 0x3a2   : > { %1258 = dma.vmem_to_hbm [thread:$0]  (%p1870_p1), %s1795_s26, 256, %s1800_s18, %s932_s15, %s1532_s17, %s1532_s17, %s1533_s10  }
 0x3a3 PF: > { %s960_s12 = sand.u32 1, %s1509_s21   ;;  %p1871_p12 = scmp.ne.s32.totalorder %s1857_s28, 0 }
 0x3a4   : > { %p1872_p9 = scmp.ge.s32.totalorder %s1521_s24, 2  ;;  %s961_s25 = scalar_lea.sflag [#allocation4], %s960_s12 }
 0x3a6   : > { %p1275_p13 = pnand %p1872_p9, %p1871_p12 }
 0x3a8   : > { %p1276_p0 = pneg %p1275_p13 }
 0x3aa   : > { %1504 = dma.done.wait (%p1276_p0), %s961_s25, 256  }
 0x3ab   : > { %1506 = vsyncadd (%p1276_p0), %s961_s25, 4294967040  ;;  %p21_p2 = scmp.ge.s32.totalorder %s1658_s9, 4   ;;  %s1873_s21 = smov %s1513_s22 }
 0x3ac   : > { %s1874_s22 = smov %s1517_s23  ;;  %s1875_s23 = smov %s1668_s11 }
 0x3ad   : > { %s1876_s24 = smov %s1658_s9  ;;  %23 = sbr.rel (!%p21_p2) target bundleno = 7 (0x7), region = 101 }
 0x3b2   :  { %966 = vsyncpa [#allocation3], 1 }
 0x3b3   :  { %968 = vsyncpa [#allocation3 + $0x1], 1 }
 0x3b4   :  { %969 = vsyncpa [#allocation6], 1 }
 0x3b5   :  { %970 = vsyncpa [#allocation9], 1 }
 0x3b6   :  { %971 = vsyncpa [#allocation4], 1 }
 0x3b7   :  { %973 = vsyncpa [#allocation4 + $0x1], 1 }

</bundles_post_ra>
